<compile_context>
chip_gen: v6e
topology: v6e:2x2x1
jax: 0.10.0
libtpu: 0.0.40
codegen_flags: <defaults>
</compile_context>

<pallas_src>
import functools
import math

import jax
import jax.numpy as jnp
from jax.experimental import pallas as pl
from jax.experimental.pallas import tpu as pltpu


_VMEM_LIMIT = 40 * 1024 * 1024  # headroom below v7x's 64 MiB physical VMEM


def _pick_tile(dim, pref, multiple):
    """Largest 'nice' tile: pref if it divides dim and respects the hw multiple,
    else fall back to the full dim (always a legal block size)."""
    t = min(dim, pref)
    if t > 0 and dim % t == 0 and t % multiple == 0:
        return t
    return dim


# --------------------- embeddings: (word + pos + type) add fused w/ LayerNorm ---------------------

def _embed_ln_kernel(tok_ref, pt_ref, g_ref, b_ref, o_ref):
    x = tok_ref[0].astype(jnp.float32) + pt_ref[...]          # (S, D) f32
    mean = jnp.mean(x, axis=-1, keepdims=True)
    var = jnp.mean(jnp.square(x - mean), axis=-1, keepdims=True)
    o_ref[0] = ((x - mean) * jax.lax.rsqrt(var + 1e-12) * g_ref[...]
                + b_ref[...]).astype(o_ref.dtype)


def embed_layernorm(tok_emb, pos_type, gamma, beta):
    B, S, D = tok_emb.shape
    return pl.pallas_call(
        _embed_ln_kernel,
        out_shape=jax.ShapeDtypeStruct((B, S, D), jnp.bfloat16),
        grid=(B,),
        in_specs=[pl.BlockSpec((1, S, D), lambda b: (b, 0, 0)),
                  pl.BlockSpec((S, D), lambda b: (0, 0)),
                  pl.BlockSpec((1, D), lambda b: (0, 0)),
                  pl.BlockSpec((1, D), lambda b: (0, 0))],
        out_specs=pl.BlockSpec((1, S, D), lambda b: (b, 0, 0)),
        compiler_params=pltpu.CompilerParams(
            dimension_semantics=("parallel",),
            vmem_limit_bytes=_VMEM_LIMIT),
    )(tok_emb, pos_type.astype(jnp.float32),
      gamma.reshape(1, D).astype(jnp.float32),
      beta.reshape(1, D).astype(jnp.float32))


# --------------------- fused attention block: QKV -> MHA -> proj -> +res -> LN --------------------

def _attn_block_kernel(x_ref, wqkv_ref, bqkv_ref, bias_ref, wo_ref, bo_ref,
                       g_ref, b_ref, o_ref, *, num_heads, head_dim, scale):
    D = num_heads * head_dim
    x = x_ref[0]                                               # (S, D) bf16
    # Fused Q/K/V projection (single (S,D)@(D,3D) MXU pass), f32 accumulate, bf16 for attention.
    qkv = (jnp.dot(x, wqkv_ref[...], preferred_element_type=jnp.float32)
           + bqkv_ref[...]).astype(jnp.bfloat16)               # (S, 3D)
    bias = bias_ref[0]                                         # (1, S) additive mask bias, f32

    heads = []
    for h in range(num_heads):                                 # all heads of this batch element
        lo = h * head_dim
        q = qkv[:, lo:lo + head_dim]                           # (S, Dh) bf16
        k = qkv[:, D + lo:D + lo + head_dim]
        v = qkv[:, 2 * D + lo:2 * D + lo + head_dim]
        # q @ k^T without an explicit transpose (contract the last dims of both).
        s = jax.lax.dot_general(q, k, (((1,), (1,)), ((), ())),
                                preferred_element_type=jnp.float32) * scale + bias
        m = jnp.max(s, axis=-1, keepdims=True)
        p = jnp.exp(s - m)
        p = p * pl.reciprocal(jnp.sum(p, axis=-1, keepdims=True), approx=True)
        heads.append(jnp.dot(p.astype(jnp.bfloat16), v,
                             preferred_element_type=jnp.float32))
    ctx = jnp.concatenate(heads, axis=-1).astype(jnp.bfloat16)  # (S, D)

    # Output projection + bias + residual + LayerNorm epilogue, all in f32.
    y = (jnp.dot(ctx, wo_ref[...], preferred_element_type=jnp.float32)
         + bo_ref[...] + x.astype(jnp.float32))
    mean = jnp.mean(y, axis=-1, keepdims=True)
    var = jnp.mean(jnp.square(y - mean), axis=-1, keepdims=True)
    o_ref[0] = ((y - mean) * jax.lax.rsqrt(var + 1e-12) * g_ref[...]
                + b_ref[...]).astype(o_ref.dtype)


def attention_block(h, attn_bias, wqkv, bqkv, wo, bo, gamma, beta, *, num_heads):
    B, S, D = h.shape
    assert D % num_heads == 0
    Dh = D // num_heads
    kern = functools.partial(_attn_block_kernel, num_heads=num_heads,
                             head_dim=Dh, scale=1.0 / math.sqrt(Dh))
    return pl.pallas_call(
        kern,
        out_shape=jax.ShapeDtypeStruct((B, S, D), jnp.bfloat16),
        grid=(B,),
        in_specs=[pl.BlockSpec((1, S, D), lambda b: (b, 0, 0)),
                  pl.BlockSpec((D, 3 * D), lambda b: (0, 0)),   # constant -> VMEM resident
                  pl.BlockSpec((1, 3 * D), lambda b: (0, 0)),
                  pl.BlockSpec((1, 1, S), lambda b: (b, 0, 0)),
                  pl.BlockSpec((D, D), lambda b: (0, 0)),       # constant -> VMEM resident
                  pl.BlockSpec((1, D), lambda b: (0, 0)),
                  pl.BlockSpec((1, D), lambda b: (0, 0)),
                  pl.BlockSpec((1, D), lambda b: (0, 0))],
        out_specs=pl.BlockSpec((1, S, D), lambda b: (b, 0, 0)),
        compiler_params=pltpu.CompilerParams(
            dimension_semantics=("parallel",),
            vmem_limit_bytes=_VMEM_LIMIT),
    )(h, wqkv, bqkv.reshape(1, 3 * D).astype(jnp.float32), attn_bias,
      wo, bo.reshape(1, D).astype(jnp.float32),
      gamma.reshape(1, D).astype(jnp.float32),
      beta.reshape(1, D).astype(jnp.float32))


# --------------------- fused FFN block: W1 -> GELU -> W2 -> +res -> LN ----------------------------

def _ffn_block_kernel(x_ref, w1_ref, b1_ref, w2_ref, b2_ref, g_ref, b_ref, o_ref):
    x = x_ref[...]                                             # (tm, D) bf16
    h1 = (jnp.dot(x, w1_ref[...], preferred_element_type=jnp.float32)
          + b1_ref[...])
    # TODO(synk): HF BERT uses exact erf-GELU; tanh-approx kept for robust Mosaic lowering.
    h1 = jax.nn.gelu(h1, approximate=True).astype(jnp.bfloat16)
    y = (jnp.dot(h1, w2_ref[...], preferred_element_type=jnp.float32)
         + b2_ref[...] + x.astype(jnp.float32))
    mean = jnp.mean(y, axis=-1, keepdims=True)
    var = jnp.mean(jnp.square(y - mean), axis=-1, keepdims=True)
    o_ref[...] = ((y - mean) * jax.lax.rsqrt(var + 1e-12) * g_ref[...]
                  + b_ref[...]).astype(o_ref.dtype)


def ffn_block(x2d, w1, b1, w2, b2, gamma, beta, *, tm_pref=256):
    M, D = x2d.shape
    F = w1.shape[1]
    tm = _pick_tile(M, tm_pref, 8)
    return pl.pallas_call(
        _ffn_block_kernel,
        out_shape=jax.ShapeDtypeStruct((M, D), jnp.bfloat16),
        grid=(M // tm,),
        in_specs=[pl.BlockSpec((tm, D), lambda i: (i, 0)),
                  pl.BlockSpec((D, F), lambda i: (0, 0)),       # constant -> VMEM resident
                  pl.BlockSpec((1, F), lambda i: (0, 0)),
                  pl.BlockSpec((F, D), lambda i: (0, 0)),       # constant -> VMEM resident
                  pl.BlockSpec((1, D), lambda i: (0, 0)),
                  pl.BlockSpec((1, D), lambda i: (0, 0)),
                  pl.BlockSpec((1, D), lambda i: (0, 0))],
        out_specs=pl.BlockSpec((tm, D), lambda i: (i, 0)),
        compiler_params=pltpu.CompilerParams(
            dimension_semantics=("parallel",),
            vmem_limit_bytes=_VMEM_LIMIT),
    )(x2d, w1, b1.reshape(1, F).astype(jnp.float32),
      w2, b2.reshape(1, D).astype(jnp.float32),
      gamma.reshape(1, D).astype(jnp.float32),
      beta.reshape(1, D).astype(jnp.float32))


# --------------------- BatchNorm1d (eval) ---------------------------------------------------------

def _batchnorm_kernel(x_ref, g_ref, b_ref, m_ref, v_ref, o_ref):
    x = x_ref[...].astype(jnp.float32)
    inv = jax.lax.rsqrt(v_ref[...] + 1e-5)
    o_ref[...] = (x - m_ref[...]) * inv * g_ref[...] + b_ref[...]


def batchnorm1d_eval(x, gamma, beta, running_mean, running_var):
    B, D = x.shape
    return pl.pallas_call(
        _batchnorm_kernel,
        out_shape=jax.ShapeDtypeStruct((B, D), jnp.float32),
        grid=(1,),
        in_specs=[pl.BlockSpec((B, D), lambda i: (0, 0))]
                 + [pl.BlockSpec((1, D), lambda i: (0, 0))] * 4,
        out_specs=pl.BlockSpec((B, D), lambda i: (0, 0)),
    )(x, gamma.reshape(1, D).astype(jnp.float32),
      beta.reshape(1, D).astype(jnp.float32),
      running_mean.reshape(1, D).astype(jnp.float32),
      running_var.reshape(1, D).astype(jnp.float32))


# --------------------- model forward (glue + kernels) ---------------------------------------------

def utterance_embedding_forward(x_ids, params, *, num_heads):
    B, S = x_ids.shape
    D = params["word_emb"].shape[1]

    # attn_mask = x.ne(0)  ->  additive bias (B, 1, S)
    mask = (x_ids != 0).astype(jnp.float32)
    attn_bias = ((1.0 - mask) * (-1e9))[:, None, :]

    # Embeddings: token gather is XLA glue; (pos + type) add is fused into the LayerNorm kernel.
    tok = params["word_emb"][x_ids]                                  # (B, S, D) f32
    pos_type = params["pos_emb"][:S] + params["type_emb"][0][None, :]
    h = embed_layernorm(tok, pos_type, params["emb_ln_g"], params["emb_ln_b"])  # (B, S, D) bf16

    for layer in params["layers"]:
        # Fused attention block (QKV proj + MHA + out proj + residual + LN) — one kernel.
        h = attention_block(h, attn_bias, layer["w_qkv"], layer["b_qkv"],
                            layer["wo"], layer["bo"],
                            layer["attn_ln_g"], layer["attn_ln_b"],
                            num_heads=num_heads)
        # Fused FFN block (W1 + GELU + W2 + residual + LN) — one kernel. Free reshape to 2-D.
        h2 = ffn_block(h.reshape(B * S, D), layer["w1"], layer["b1"],
                       layer["w2"], layer["b2"],
                       layer["ffn_ln_g"], layer["ffn_ln_b"])
        h = h2.reshape(B, S, D)

    # CLS token (last_hidden_state[:, 0, :]) — cheap XLA slice — then BatchNorm1d (eval).
    cls = h[:, 0, :]
    return batchnorm1d_eval(cls, params["bn_g"], params["bn_b"],
                            params["bn_mean"], params["bn_var"])


# --------------------- deterministic parameter init -----------------------------------------------

def init_params(key, *, vocab, max_pos, D, H, FFN, L, lora_r=8, lora_alpha=32):
    def nrm(k, shape, scale=0.02):
        return scale * jax.random.normal(k, shape, dtype=jnp.float32)

    keys = jax.random.split(key, 8 + L)
    params = {
        "word_emb": nrm(keys[0], (vocab, D)),
        "pos_emb": nrm(keys[1], (max_pos, D)),
        "type_emb": nrm(keys[2], (2, D)),
        "emb_ln_g": jnp.ones((D,), jnp.float32),
        "emb_ln_b": jnp.zeros((D,), jnp.float32),
        "bn_g": 1.0 + nrm(keys[3], (D,), 0.1),
        "bn_b": nrm(keys[4], (D,), 0.1),
        "bn_mean": nrm(keys[5], (D,), 0.1),
        "bn_var": 1.0 + jnp.abs(nrm(keys[6], (D,), 0.1)),
        "layers": [],
    }
    scale_lora = lora_alpha / lora_r
    for l in range(L):
        lk = jax.random.split(keys[8 + l], 16)

        def lora_dense(kw, ka, kb):
            w = nrm(kw, (D, D))                 # stored as (in, out) = W.T
            A = nrm(ka, (lora_r, D))            # lora_A: (r, in)
            Bm = nrm(kb, (D, lora_r))           # lora_B: (out, r); nonzero to exercise the path
            return w + scale_lora * (A.T @ Bm.T)

        wq = lora_dense(lk[0], lk[1], lk[2]); bq = nrm(lk[3], (D,))
        wk = lora_dense(lk[4], lk[5], lk[6]); bk = nrm(lk[7], (D,))
        wv = lora_dense(lk[8], lk[9], lk[10]); bv = nrm(lk[11], (D,))

        layer = {
            # Fused QKV weight (D, 3D) stored in bf16 for the MXU; biases kept f32.
            "w_qkv": jnp.concatenate([wq, wk, wv], axis=1).astype(jnp.bfloat16),
            "b_qkv": jnp.concatenate([bq, bk, bv]),
            "wo": nrm(lk[12], (D, D)).astype(jnp.bfloat16),
            "bo": jnp.zeros((D,), jnp.float32),
            "w1": nrm(lk[13], (D, FFN)).astype(jnp.bfloat16),
            "b1": jnp.zeros((FFN,), jnp.float32),
            "w2": nrm(lk[14], (FFN, D)).astype(jnp.bfloat16),
            "b2": jnp.zeros((D,), jnp.float32),
            "attn_ln_g": jnp.ones((D,), jnp.float32),
            "attn_ln_b": jnp.zeros((D,), jnp.float32),
            "ffn_ln_g": jnp.ones((D,), jnp.float32),
            "ffn_ln_b": jnp.zeros((D,), jnp.float32),
        }
        params["layers"].append(layer)
    return params


if __name__ == "__main__":
    B, S, D, H, FFN, L = 2, 8, 32, 4, 64, 2      # small MiniLM-like config
    VOCAB, MAX_POS = 100, 16

    key = jax.random.PRNGKey(0)
    k_par, k_ids = jax.random.split(key)
    params = init_params(k_par, vocab=VOCAB, max_pos=MAX_POS, D=D, H=H, FFN=FFN, L=L)

    x = jax.random.randint(k_ids, (B, S), 1, VOCAB, dtype=jnp.int32)
    x = x.at[0, 6:].set(0).at[1, 5:].set(0)      # padding -> x.ne(0) mask has zeros

    out = utterance_embedding_forward(x, params, num_heads=H)
    out = jax.block_until_ready(out)
    assert out.shape == (B, D) and out.dtype == jnp.float32
    assert bool(jnp.all(jnp.isfinite(out)))
    print("KERNEL_OK")
</pallas_src>

<mosaic_0001>
module attributes {stable_mosaic.version = 11 : i64} {
  func.func @_embed_ln_kernel(%arg0: i32, %arg1: memref<1x8x32xf32, #tpu.memory_space<vmem>>, %arg2: memref<8x32xf32, #tpu.memory_space<vmem>>, %arg3: memref<1x32xf32, #tpu.memory_space<vmem>>, %arg4: memref<1x32xf32, #tpu.memory_space<vmem>>, %arg5: memref<1x8x32xbf16, #tpu.memory_space<vmem>>) attributes {dimension_semantics = [#tpu.dimension_semantics<parallel>], iteration_bounds = array<i64: 2>, scalar_prefetch = 0 : i64, scratch_operands = 0 : i64, tpu.core_type = #tpu.core_type<tc>, window_params = [{transform_indices = @transform_0, window_bounds = array<i64: 1, 8, 32>}, {pipeline_mode = #tpu.pipeline_mode<synchronous>, transform_indices = @transform_1, window_bounds = array<i64: 8, 32>}, {pipeline_mode = #tpu.pipeline_mode<synchronous>, transform_indices = @transform_2, window_bounds = array<i64: 1, 32>}, {pipeline_mode = #tpu.pipeline_mode<synchronous>, transform_indices = @transform_3, window_bounds = array<i64: 1, 32>}, {transform_indices = @transform_4, window_bounds = array<i64: 1, 8, 32>}]} {
    %c0 = arith.constant 0 : index
    %c0_0 = arith.constant 0 : index
    %c0_1 = arith.constant 0 : index
    %0 = vector.load %arg1[%c0, %c0_0, %c0_1] : memref<1x8x32xf32, #tpu.memory_space<vmem>>, vector<1x8x32xf32>
    %1 = vector.shape_cast %0 : vector<1x8x32xf32> to vector<8x32xf32>
    %c0_2 = arith.constant 0 : index
    %c0_3 = arith.constant 0 : index
    %2 = vector.load %arg2[%c0_2, %c0_3] : memref<8x32xf32, #tpu.memory_space<vmem>>, vector<8x32xf32>
    %3 = arith.addf %1, %2 : vector<8x32xf32>
    %cst = arith.constant dense<0.000000e+00> : vector<8xf32>
    %4 = vector.multi_reduction <add>, %3, %cst [1] : vector<8x32xf32> to vector<8xf32>
    %5 = vector.shape_cast %4 : vector<8xf32> to vector<8x1xf32>
    %cst_4 = arith.constant 3.200000e+01 : f32
    %6 = vector.broadcast %cst_4 : f32 to vector<8x1xf32>
    %7 = arith.divf %5, %6 : vector<8x1xf32>
    %8 = vector.broadcast %7 : vector<8x1xf32> to vector<8x32xf32>
    %9 = arith.subf %3, %8 : vector<8x32xf32>
    %10 = arith.mulf %9, %9 : vector<8x32xf32>
    %cst_5 = arith.constant dense<0.000000e+00> : vector<8xf32>
    %11 = vector.multi_reduction <add>, %10, %cst_5 [1] : vector<8x32xf32> to vector<8xf32>
    %12 = vector.shape_cast %11 : vector<8xf32> to vector<8x1xf32>
    %cst_6 = arith.constant 3.200000e+01 : f32
    %13 = vector.broadcast %cst_6 : f32 to vector<8x1xf32>
    %14 = arith.divf %12, %13 : vector<8x1xf32>
    %15 = vector.broadcast %7 : vector<8x1xf32> to vector<8x32xf32>
    %16 = arith.subf %3, %15 : vector<8x32xf32>
    %cst_7 = arith.constant 9.99999996E-13 : f32
    %17 = vector.broadcast %cst_7 : f32 to vector<8x1xf32>
    %18 = arith.addf %14, %17 : vector<8x1xf32>
    %19 = math.rsqrt %18 : vector<8x1xf32>
    %20 = vector.broadcast %19 : vector<8x1xf32> to vector<8x32xf32>
    %21 = arith.mulf %16, %20 : vector<8x32xf32>
    %c0_8 = arith.constant 0 : index
    %c0_9 = arith.constant 0 : index
    %22 = vector.load %arg3[%c0_8, %c0_9] : memref<1x32xf32, #tpu.memory_space<vmem>>, vector<1x32xf32>
    %23 = vector.broadcast %22 : vector<1x32xf32> to vector<8x32xf32>
    %24 = arith.mulf %21, %23 : vector<8x32xf32>
    %c0_10 = arith.constant 0 : index
    %c0_11 = arith.constant 0 : index
    %25 = vector.load %arg4[%c0_10, %c0_11] : memref<1x32xf32, #tpu.memory_space<vmem>>, vector<1x32xf32>
    %26 = vector.broadcast %25 : vector<1x32xf32> to vector<8x32xf32>
    %27 = arith.addf %24, %26 : vector<8x32xf32>
    %28 = arith.truncf %27 : vector<8x32xf32> to vector<8x32xbf16>
    %c0_12 = arith.constant 0 : index
    %c0_13 = arith.constant 0 : index
    %c0_14 = arith.constant 0 : index
    %29 = vector.load %arg5[%c0_12, %c0_13, %c0_14] : memref<1x8x32xbf16, #tpu.memory_space<vmem>>, vector<1x8x32xbf16>
    %30 = vector.shape_cast %29 : vector<1x8x32xbf16> to vector<8x32xbf16>
    %31 = vector.shape_cast %28 : vector<8x32xbf16> to vector<1x8x32xbf16>
    tpu.vector_store %arg5[%c0_12, %c0_13, %c0_14], %31 {strides = array<i32>} : memref<1x8x32xbf16, #tpu.memory_space<vmem>>, vector<1x8x32xbf16>,
    return
  }
  func.func @transform_0(%arg0: i32) -> (i32, i32, i32) {
    %c0_i32 = arith.constant 0 : i32
    %c0_i32_0 = arith.constant 0 : i32
    %c0_i32_1 = arith.constant 0 : i32
    return %arg0, %c0_i32, %c0_i32_0 : i32, i32, i32
  }
  func.func @transform_1(%arg0: i32) -> (i32, i32) {
    %c0_i32 = arith.constant 0 : i32
    %c0_i32_0 = arith.constant 0 : i32
    %c0_i32_1 = arith.constant 0 : i32
    return %c0_i32, %c0_i32_0 : i32, i32
  }
  func.func @transform_2(%arg0: i32) -> (i32, i32) {
    %c0_i32 = arith.constant 0 : i32
    %c0_i32_0 = arith.constant 0 : i32
    %c0_i32_1 = arith.constant 0 : i32
    return %c0_i32, %c0_i32_0 : i32, i32
  }
  func.func @transform_3(%arg0: i32) -> (i32, i32) {
    %c0_i32 = arith.constant 0 : i32
    %c0_i32_0 = arith.constant 0 : i32
    %c0_i32_1 = arith.constant 0 : i32
    return %c0_i32, %c0_i32_0 : i32, i32
  }
  func.func @transform_4(%arg0: i32) -> (i32, i32, i32) {
    %c0_i32 = arith.constant 0 : i32
    %c0_i32_0 = arith.constant 0 : i32
    %c0_i32_1 = arith.constant 0 : i32
    return %arg0, %c0_i32, %c0_i32_0 : i32, i32, i32
  }
}

</mosaic_0001>

<bundles_post_ra>
// kernel: tpu_custom_call.1
= control target key start
LH: loop header
LB: loop body
LE: loop exit
PB: predicated region body
PF: predicated region fallthrough
CT: control target
= control target key end

     0   :  { %9 = vsyncpa [#allocation3], 0  ;;  %s757_s0 = inlined_call_operand.hbm [shape: f32[2,8,32], index: 0, kind: input, shape index: {}]   ;;  %s758_s1 = inlined_call_operand.hbm [shape: f32[8,32], index: 1, kind: input, shape index: {}]   ;;  %s759_s2 = inlined_call_operand.vmem [shape: f32[1,32], index: 2, kind: input, shape index: {}]   ;;  %s760_s3 = inlined_call_operand.vmem [shape: f32[1,32], index: 3, kind: input, shape index: {}]   ;;  %s761_s4 = inlined_call_operand.hbm [shape: bf16[2,8,32], index: 4, kind: output, shape index: {}]  }
   0x1   :  { %11 = vsyncpa [#allocation3 + $0x1], 0 }
   0x2   :  { %12 = vsyncpa [#allocation6], 0 }
   0x3   :  { %13 = vsyncpa [#allocation4], 0 }
   0x4   :  { %15 = vsyncpa [#allocation4 + $0x1], 0  ;;  %s584_s15 = smov 0   ;;  %s586_s16 = smov 0  }
   0x5   :  { %s588_s17 = smov 0   ;;  %s590_s18 = smov 0  }
   0x6 LB: > { %s605_s19 = sadd.s32 4294967295, %s554_s18   ;;  %s357_s20 = sadd.s32 4294967294, %s554_s18   ;;  %s554_s18 = sphi %s590_s18, %s784_s18   ;;  %s550_s17 = sphi %s588_s17, %s783_s17   ;;  %s546_s16 = sphi %s586_s16, %s782_s16   ;;  %s542_s15 = sphi %s584_s15, %s781_s15  }
   0x7   : > { %p41_p0 = scmp.ne.s32.totalorder %s546_s16, %s542_s15  ;;  %p762_p1 = scmp.eq.s32.totalorder %s605_s19, 0 }
   0x8   : > { %p134_p3 = scmp.eq.s32.totalorder %s357_s20, 1  ;;  %p358_p5 = scmp.ge.s32.totalorder %s554_s18, 1 }
   0x9   : > { %p614_p4 = por %p762_p1, %p41_p0  ;;  %p141_p7 = scmp.lt.s32.totalorder %s554_s18, 3 }
   0xa   : > { %p619_p6 = por %p134_p3, %p41_p0  ;;  %s556_s24 = smov [#allocation5]  }
   0xb   : > { %s766_s21 = scalar_select %p614_p4, 1, 0 }
   0xc   : > { %s767_s22 = scalar_select %p619_p6, 1, 0 }
   0xd   : > { %p624_p8 = pnand %p358_p5, %p141_p7  ;;  %s154_s25 = sshll.u32 %s556_s24, 4  ;;  %s155_s25 = int_to_ptr.vmem [resolvable:$true] %s154_s25 }
   0xe   : > { %s632_s26 = sadd.s32 1, %s554_s18   ;;  %s28_s30 = sadd.s32 1, %s550_s17 }
   0xf   : > { %s768_s23 = scalar_select %p624_p8, 1, 0 }
  0x10   : > { %p381_p10 = pneg %p624_p8  ;;  %s25_s28 = ssub.s32 %s554_s18, %s632_s26 }
  0x11   : > { %p642_p12 = scmp.eq.s32.totalorder %s25_s28, 0  ;;  %p35_p13 = scmp.ne.s32.totalorder %s550_s17, %s546_s16 }
  0x12   : > { %p636_p11 = pnand %p381_p10, %p762_p1  ;;  %s443_s5 = scalar_lea.vmem %s155_s25, 128 }
  0x13   : > { %p444_p3 = scmp.ne.s32.totalorder %s155_s25, %s443_s5  ;;  %p451_p9 = scmp.lt.s32.totalorder %s155_s25, %s155_s25 }
  0x14   : > { %p434_p0 = pneg %p636_p11  ;;  %p452_p2 = scmp.lt.s32.totalorder %s443_s5, %s443_s5 }
  0x16   : > { %p446_p5 = pnand %p444_p3, %p434_p0  ;;  %p453_p10 = por %p452_p2, %p451_p9 }
  0x18   : > { %p447_p7 = pneg %p446_p5 }
  0x1a   : > { %p454_p1 = pnand %p453_p10, %p447_p7 }
  0x1c   : > { %457 = shalt.err (!%p454_p1)
}
  0x1d   : > { %384 = dma.hbm_to_vmem [thread:$0]  (!%p636_p11), %s758_s1, 128, %s155_s25, [#allocation6]  }
  0x1e   : > { %s659_s8 = scalar_select %p642_p12, %s550_s17, %s28_s30  }
  0x1f   : > { %p36_p1 = scmp.eq.s32.totalorder %s554_s18, 0  ;;  %p771_p2 = scmp.eq.s32.totalorder %s605_s19, 1 }
  0x20   : > { %p394_p0 = scmp.lt.s32.totalorder %s554_s18, 2  ;;  %s171_s10 = sand.u32 1, %s550_s17  }
  0x21   : > { %p667_p9 = por %p771_p2, %p35_p13  ;;  %p37_p3 = por %p36_p1, %p35_p13 }
  0x22   : > { %s361_s11 = sshll.u32 %s171_s10, 3  ;;  %s362_s12 = sshll.u32 %s554_s18, 7 }
  0x23   : > { %s772_s9 = scalar_select %p667_p9, 1, 0 }
  0x24   : > { %s680_s20 = scalar_lea.hbm %s757_s0, %s362_s12  ;;  %s175_s24 = scalar_lea.vmem [#allocation2], %s361_s11 }
  0x25   : > { %s182_s25 = sshll.u32 %s175_s24, 4  ;;  %p682_p11 = pnand %p394_p0, %p37_p3  ;;  %s183_s25 = int_to_ptr.vmem [resolvable:$true] %s182_s25 }
  0x26   : > { %s172_s28 = scalar_lea.sflag [#allocation3], %s171_s10  ;;  %s458_s29 = scalar_lea.hbm %s680_s20, 128 }
  0x27   : > { %p459_p12 = scmp.ne.s32.totalorder %s680_s20, %s458_s29  ;;  %p460_p13 = pneg %p682_p11 }
  0x28   : > { %s463_s6 = scalar_lea.hbm %s757_s0, 256  ;;  %p464_p10 = scmp.lt.s32.totalorder %s680_s20, %s757_s0 }
  0x29   : > { %p461_p5 = pnand %p460_p13, %p459_p12  ;;  %p465_p1 = scmp.lt.s32.totalorder %s463_s6, %s458_s29 }
  0x2b   : > { %p462_p7 = pneg %p461_p5  ;;  %p466_p2 = por %p465_p1, %p464_p10 }
  0x2d   : > { %p467_p0 = pnand %p466_p2, %p462_p7 }
  0x2f   : > { %470 = shalt.err (!%p467_p0)
}
  0x30   : > { %s471_s12 = scalar_lea.vmem %s183_s25, 128  ;;  %s557_s10 = smov [#allocation2]  }
  0x31   : > { %p472_p3 = scmp.ne.s32.totalorder %s183_s25, %s471_s12  ;;  %s476_s13 = sshll.u32 %s557_s10, 4  ;;  %s477_s13 = int_to_ptr.vmem [resolvable:$false] %s476_s13 }
  0x32   : > { %s478_s14 = scalar_lea.vmem %s477_s13, 256  ;;  %p479_p12 = scmp.lt.s32.totalorder %s183_s25, %s477_s13 }
  0x33   : > { %p474_p6 = pnand %p472_p3, %p460_p13  ;;  %p480_p5 = scmp.lt.s32.totalorder %s478_s14, %s471_s12 }
  0x35   : > { %p475_p9 = pneg %p474_p6  ;;  %p481_p4 = por %p480_p5, %p479_p12 }
  0x37   : > { %p482_p8 = pnand %p481_p4, %p475_p9 }
  0x39   : > { %485 = shalt.err (!%p482_p8)
}
  0x3a   : > { %388 = dma.hbm_to_vmem [thread:$0]  (!%p682_p11), %s680_s20, 128, %s183_s25, %s172_s28  }
  0x3b   : > { %p774_p7 = scmp.ne.s32.totalorder %s768_s23, 0 }
  0x3c   : > { %s703_s24 = sand.u32 (!%p774_p7), 1, %s546_s16   ;;  %p775_p6 = scmp.ne.s32.totalorder (!%p774_p7), %s766_s21, 0 }
  0x3d   : > { %191 = sbr.rel (%p774_p7) target bundleno = 396 (0x18c), region = 36  ;;  %s364_s29 = sshll.u32 (!%p774_p7), %s703_s24, 3 }
  0x3e   : > { %s194_s30 = scalar_lea.sflag (!%p774_p7), [#allocation3], %s703_s24  ;;  %s197_s5 = scalar_lea.vmem (!%p774_p7), [#allocation2], %s364_s29 }
  0x42   : > { %529 = dma.done.wait (%p775_p6), %s194_s30, 128  }
  0x43   : > { %531 = vsyncadd (%p775_p6), %s194_s30, 4294967168  ;;  %p776_p4 = scmp.eq.s32.totalorder %s605_s19, 0 }
  0x45   : > { %533 = dma.done.wait (%p776_p4), [#allocation6], 128   ;;  %p777_p8 = pmov %p776_p4 }
  0x46   : > { %v226_v0 = vld [vmem:[%s197_s5] sm:$0xff]  ;;  %v227_v1 = vld [vmem:[#allocation5] sm:$0xff]  ;;  %vm229_vm0 = vcmask 261120   ;;  %s366_s21 = sshll.u32 %s703_s24, 2  ;;  %s370_s28 = sshll.u32 %s605_s19, 6  ;;  %vm261_vm1 = vcmask 257024  }
  0x47   : > { %535 = vsyncadd (%p777_p8), [#allocation6], 4294967168  ;;  %v228_v2 = vadd.f32 %v227_v1, %v226_v0  ;;  %v367_v13 = vld [vmem:[%s759_s2] ss:$0 sm:$0xff]  ;;  %s225_s6 = scalar_lea.vmem [#allocation7], %s366_s21  ;;  %s275_s10 = scalar_lea.hbm %s761_s4, %s370_s28 }
  0x48   : > { %v368_v15 = vld [vmem:[%s760_s3] ss:$0 sm:$0xff]  ;;  %s277_s7 = sshll.u32 %s225_s6, 4  ;;  %s264_s13 = scalar_lea.sflag [#allocation4], %s703_s24  ;;  %s278_s7 = int_to_ptr.vmem [resolvable:$true] %s277_s7 }
  0x49   : > { %v230_v3 = vsel %vm229_vm0, %v228_v2, 0.0  ;;  %s486_s14 = scalar_lea.vmem %s278_s7, 64  ;;  %p778_p11 = scmp.ne.s32.totalorder %s772_s9, 0 }
  0x4a   : > { %231 = vadd.xlane.f32.xlu0 %v230_v3  ;;  %p487_p9 = scmp.ne.s32.totalorder %s278_s7, %s486_s14  ;;  %s558_s29 = smov [#allocation7]  }
  0x4b   : > { %s490_s30 = sshll.u32 %s558_s29, 4  ;;  %s491_s30 = int_to_ptr.vmem [resolvable:$false] %s490_s30 }
  0x4c   : > { %p488_p13 = pnand %p487_p9, %p778_p11  ;;  %s492_s19 = scalar_lea.vmem %s491_s30, 128 }
  0x4d   : > { %p493_p1 = scmp.lt.s32.totalorder %s278_s7, %s491_s30  ;;  %p494_p2 = scmp.lt.s32.totalorder %s492_s19, %s486_s14 }
  0x4e   : > { %p489_p10 = pneg %p488_p13 }
  0x4f   : > { %p495_p0 = por %p494_p2, %p493_p1 }
  0x51   : > { %p496_p3 = pnand %p495_p0, %p489_p10 }
  0xd3   : > { %v232_v4 = vpop.xlane.xlu0 %231 }
  0xd4   : > { %v234_v5 = vmul.f32 0.03125, %v232_v4 }
  0xd6   : > { %v235_v6 = vsub.f32 %v228_v2, %v234_v5 }
  0xd8   : > { %v236_v7 = vmul.f32 %v235_v6, %v235_v6 }
  0xda   : > { %v237_v8 = vsel %vm229_vm0, %v236_v7, 0.0 }
  0xdb   : > { %238 = vadd.xlane.f32.xlu0 %v237_v8 }
 0x164   : > { %v239_v9 = vpop.xlane.xlu0 %238 }
 0x165   : > { %v240_v10 = vmul.f32 0.03125, %v239_v9 }
 0x167   : > { %v241_v11 = vadd.f32 1e-12, %v240_v10 }
 0x169   : > { %430 = vrsqrt.f32 %v241_v11 }
 0x176   : > { %v431_v12 = vpop.eup %430 }
 0x177   : > { %v243_v14 = vmul.f32 %v431_v12, %v235_v6 }
 0x179   : > { %v251_v16 = vmul.f32 %v367_v13, %v243_v14 }
 0x17b   : > { %v259_v17 = vadd.f32 %v368_v15, %v251_v16 }
 0x17d   : > { %v260_v18 = vpack.c.bf16 %v259_v17, %v259_v17 }
 0x17f   : > { %262 = vst.msk [vmem:[%s225_s6] sm:$0xf] %vm261_vm1, %v260_v18 }
 0x180   : > { %499 = shalt.err (!%p496_p3)
}
 0x181   : > { %s500_s5 = scalar_lea.hbm %s275_s10, 64  ;;  %s504_s23 = scalar_lea.hbm %s761_s4, 128 }
 0x182   : > { %p501_p12 = scmp.ne.s32.totalorder %s275_s10, %s500_s5  ;;  %p505_p6 = scmp.lt.s32.totalorder %s275_s10, %s761_s4 }
 0x183   : > { %p506_p4 = scmp.lt.s32.totalorder %s504_s23, %s500_s5 }
 0x184   : > { %p502_p5 = pnand %p501_p12, %p778_p11 }
 0x185   : > { %p507_p8 = por %p506_p4, %p505_p6 }
 0x186   : > { %p503_p7 = pneg %p502_p5 }
 0x188   : > { %p508_p9 = pnand %p507_p8, %p503_p7 }
 0x18a   : > { %511 = shalt.err (!%p508_p9)
}
 0x18b   : > { %379 = dma.vmem_to_hbm [thread:$0]  (%p778_p11), %s278_s7, 64, %s275_s10, %s264_s13  }
 0x18c PF: > { %s289_s27 = sand.u32 1, %s542_s15   ;;  %p779_p13 = scmp.ne.s32.totalorder %s767_s22, 0 }
 0x18d   : > { %p780_p10 = scmp.ge.s32.totalorder %s554_s18, 2  ;;  %s290_s28 = scalar_lea.sflag [#allocation4], %s289_s27 }
 0x18f   : > { %p390_p1 = pnand %p780_p10, %p779_p13 }
 0x191   : > { %p391_p2 = pneg %p390_p1 }
 0x193   : > { %537 = dma.done.wait (%p391_p2), %s290_s28, 64  }
 0x194   : > { %539 = vsyncadd (%p391_p2), %s290_s28, 4294967232  ;;  %p18_p0 = scmp.ge.s32.totalorder %s632_s26, 4   ;;  %s781_s15 = smov %s546_s16 }
 0x195   : > { %s782_s16 = smov %s550_s17  ;;  %s783_s17 = smov %s659_s8 }
 0x196   : > { %s784_s18 = smov %s632_s26  ;;  %20 = sbr.rel (!%p18_p0) target bundleno = 6 (0x6), region = 85 }
 0x19b   :  { %295 = vsyncpa [#allocation3], 1 }
 0x19c   :  { %297 = vsyncpa [#allocation3 + $0x1], 1 }
 0x19d   :  { %298 = vsyncpa [#allocation6], 1 }
 0x19e   :  { %299 = vsyncpa [#allocation4], 1 }
 0x19f   :  { %301 = vsyncpa [#allocation4 + $0x1], 1 }

</bundles_post_ra>
